<compile_context>
chip_gen: v7x
topology: tpu7x:2x2x1
jax: 0.10.0
libtpu: 0.0.40
codegen_flags: <defaults>
</compile_context>

<pallas_src>
import functools

import jax
import jax.numpy as jnp
from jax.experimental import pallas as pl
from jax.experimental.pallas import tpu as pltpu


def _is_nonneg_int(g):
    try:
        g = float(g)
    except (TypeError, ValueError):
        return False
    return g >= 0.0 and g == int(g)


def _int_pow(base, n):
    """base**n for static non-negative int n via repeated multiply (VPU only)."""
    result = None
    acc = base
    n = int(n)
    while n > 0:
        if n & 1:
            result = acc if result is None else result * acc
        n >>= 1
        if n:
            acc = acc * acc
    return jnp.ones_like(base) if result is None else result


def _asl_elementwise_loss(x, y, *, gamma_neg, gamma_pos, clip, eps, binary_fast):
    """Per-element (un-negated) ASL loss for f32 logits x and targets y."""
    xs_pos = 1.0 / (1.0 + jnp.exp(-x))              # sigmoid (EUP exp + VPU)
    xs_neg = 1.0 - xs_pos
    if clip is not None and clip > 0:               # asymmetric clipping
        xs_neg = jnp.minimum(xs_neg + clip, 1.0)

    if binary_fast:
        # y is a binarized {0,1} vector and gammas are non-negative ints:
        # select the relevant probability once -> 1 log; focal weight via
        # integer powers on the VPU (no extra EUP work).
        y_is_pos = y > 0.5
        prob = jnp.where(y_is_pos, xs_pos, xs_neg)
        loss = jnp.log(jnp.maximum(prob, eps))
        if gamma_neg > 0 or gamma_pos > 0:
            base = 1.0 - prob                       # in [0, 1]; 0**k handled by _int_pow
            w = jnp.where(y_is_pos,
                          _int_pow(base, int(gamma_pos)),
                          _int_pow(base, int(gamma_neg)))
            loss = loss * w
        return loss

    # General path (arbitrary y, fractional gammas) — matches the formula.
    anti = 1.0 - y
    loss = y * jnp.log(jnp.maximum(xs_pos, eps))
    loss = loss + anti * jnp.log(jnp.maximum(xs_neg, eps))
    if gamma_neg > 0 or gamma_pos > 0:
        base = 1.0 - xs_pos * y - xs_neg * anti     # in [0, 1]
        expo = gamma_pos * y + gamma_neg * anti
        # pow(base, expo) via exp/log, with torch-compatible handling of base==0
        # (0**pos == 0, 0**0 == 1).
        w = jnp.exp(expo * jnp.log(jnp.maximum(base, 1e-38)))
        w = jnp.where(base > 0.0, w, jnp.where(expo > 0.0, 0.0, 1.0))
        loss = loss * w
    return loss


def _asl_kernel_whole(x_ref, y_ref, out_ref, *, loss_kwargs):
    """Grid-free path: whole arrays as single VMEM blocks, scalar SMEM output."""
    x = x_ref[...].astype(jnp.float32)              # in-kernel cast (bf16 -> f32)
    y = y_ref[...].astype(jnp.float32)
    loss = _asl_elementwise_loss(x, y, **loss_kwargs)
    out_ref[0, 0] = -jnp.sum(loss)                  # single fused reduction


def _asl_kernel_tiled(x_ref, y_ref, out_ref, *,
                      loss_kwargs, n_rows, tile_rows, need_mask):
    """Row-tiled reduction path: accumulate -sum into the resident SMEM output."""
    i = pl.program_id(0)

    @pl.when(i == 0)
    def _init():
        out_ref[0, 0] = jnp.float32(0.0)

    x = x_ref[...].astype(jnp.float32)
    y = y_ref[...].astype(jnp.float32)
    loss = _asl_elementwise_loss(x, y, **loss_kwargs)

    if need_mask:
        # Mask the ragged rows of the final tile (OOB block contents undefined).
        row = jax.lax.broadcasted_iota(jnp.int32, loss.shape, 0) + i * tile_rows
        loss = jnp.where(row < n_rows, loss, 0.0)

    out_ref[0, 0] = out_ref[0, 0] - jnp.sum(loss)


def asymmetric_loss(x, y, *, gamma_neg=4, gamma_pos=1, clip=0.05, eps=1e-8,
                    assume_binary_targets=True, tile_rows=None,
                    tile_bytes=1 << 20):
    """Pallas equivalent of AsymmetricLossOptimized.forward; returns a scalar."""
    if x.shape != y.shape:
        raise ValueError("x and y must have the same shape")
    if x.size == 0:
        return jnp.float32(0.0)

    # ASL is elementwise + global sum: collapse any rank to 2D (rows, classes).
    if x.ndim == 0:
        x2, y2 = x.reshape(1, 1), y.reshape(1, 1)
    elif x.ndim == 1:
        x2, y2 = x.reshape(1, -1), y.reshape(1, -1)
    elif x.ndim == 2:
        x2, y2 = x, y
    else:
        x2 = x.reshape(-1, x.shape[-1])
        y2 = y.reshape(-1, y.shape[-1])

    n_rows, n_cols = x2.shape
    binary_fast = (assume_binary_targets
                   and _is_nonneg_int(gamma_pos) and _is_nonneg_int(gamma_neg))
    loss_kwargs = dict(gamma_neg=gamma_neg, gamma_pos=gamma_pos,
                       clip=clip, eps=eps, binary_fast=binary_fast)

    # Adaptive row tile: ~tile_bytes of the (larger) input per block, sublane
    # aligned; keeps double-buffered inputs + f32 temporaries well under the
    # VMEM scoped limit on every chip generation.
    if tile_rows is None:
        bytes_per_row = max(1, n_cols * max(x2.dtype.itemsize, y2.dtype.itemsize))
        tile_rows = max(8, min(2048, (tile_bytes // bytes_per_row) // 8 * 8))
    else:
        tile_rows = max(8, (int(tile_rows) // 8) * 8)

    out_shape = jax.ShapeDtypeStruct((1, 1), jnp.float32)
    smem_out = pl.BlockSpec(memory_space=pltpu.MemorySpace.SMEM)

    if n_rows <= tile_rows:
        # Small case: no grid at all -> no per-step pipeline overhead.
        out = pl.pallas_call(
            functools.partial(_asl_kernel_whole, loss_kwargs=loss_kwargs),
            out_shape=out_shape,
            in_specs=[pl.BlockSpec(memory_space=pltpu.MemorySpace.VMEM),
                      pl.BlockSpec(memory_space=pltpu.MemorySpace.VMEM)],
            out_specs=smem_out,
        )(x2, y2)
    else:
        grid = (pl.cdiv(n_rows, tile_rows),)
        need_mask = (n_rows % tile_rows) != 0
        # TODO(synk): for very large n_rows on v7x, split the grid across the 2
        # TensorCores (per-core partial sums combined in the wrapper).
        out = pl.pallas_call(
            functools.partial(_asl_kernel_tiled, loss_kwargs=loss_kwargs,
                              n_rows=n_rows, tile_rows=tile_rows,
                              need_mask=need_mask),
            out_shape=out_shape,
            grid=grid,
            in_specs=[pl.BlockSpec((tile_rows, n_cols), lambda i: (i, 0)),
                      pl.BlockSpec((tile_rows, n_cols), lambda i: (i, 0))],
            out_specs=smem_out,
            compiler_params=pltpu.CompilerParams(
                dimension_semantics=("arbitrary",)),
        )(x2, y2)
    return out[0, 0]


def asl_reference(x, y, gamma_neg=4, gamma_pos=1, clip=0.05, eps=1e-8):
    """Plain-JAX mirror of the PyTorch forward (for verification)."""
    x = x.astype(jnp.float32)
    y = y.astype(jnp.float32)
    xs_pos = 1.0 / (1.0 + jnp.exp(-x))
    xs_neg = 1.0 - xs_pos
    if clip is not None and clip > 0:
        xs_neg = jnp.minimum(xs_neg + clip, 1.0)
    loss = y * jnp.log(jnp.maximum(xs_pos, eps))
    loss = loss + (1.0 - y) * jnp.log(jnp.maximum(xs_neg, eps))
    if gamma_neg > 0 or gamma_pos > 0:
        w = jnp.power(1.0 - xs_pos * y - xs_neg * (1.0 - y),
                      gamma_pos * y + gamma_neg * (1.0 - y))
        loss = loss * w
    return -jnp.sum(loss)


if __name__ == "__main__":
    key = jax.random.PRNGKey(0)
    k1, k2, k3, k4 = jax.random.split(key, 4)

    # Case 1: small (batch=8, labels=128) -> grid-free whole-array path
    # (binary-target / integer-gamma fast path).
    b1, c1 = 8, 128
    x1 = jax.random.normal(k1, (b1, c1), dtype=jnp.float32).astype(jnp.bfloat16)
    y1 = (jax.random.uniform(k2, (b1, c1)) < 0.25).astype(jnp.float32)
    out1 = jax.block_until_ready(asymmetric_loss(x1, y1))
    ref1 = jax.block_until_ready(asl_reference(x1, y1))
    assert jnp.allclose(out1, ref1, rtol=1e-4, atol=1e-2), (out1, ref1)

    # Case 1b: same inputs through the fully general exp/log pow path.
    out1b = jax.block_until_ready(
        asymmetric_loss(x1, y1, assume_binary_targets=False))
    assert jnp.allclose(out1b, ref1, rtol=1e-4, atol=1e-2), (out1b, ref1)

    # Case 2: larger (batch=300, labels=256), tile_rows=128 -> tiled reduction
    # path with a ragged last tile (row masking exercised).
    b2, c2 = 300, 256
    x2 = jax.random.normal(k3, (b2, c2), dtype=jnp.float32).astype(jnp.bfloat16)
    y2 = (jax.random.uniform(k4, (b2, c2)) < 0.25).astype(jnp.float32)
    out2 = jax.block_until_ready(asymmetric_loss(x2, y2, tile_rows=128))
    ref2 = jax.block_until_ready(asl_reference(x2, y2))
    assert jnp.allclose(out2, ref2, rtol=1e-4, atol=1e-2), (out2, ref2)

    print("KERNEL_OK")
</pallas_src>

<mosaic_0001>
module attributes {stable_mosaic.version = 11 : i64} {
  func.func @_asl_kernel_whole(%arg0: memref<8x128xbf16, #tpu.memory_space<vmem>>, %arg1: memref<8x128xf32, #tpu.memory_space<vmem>>, %arg2: memref<1x1xf32, #tpu.memory_space<smem>>) attributes {dimension_semantics = [], scalar_prefetch = 0 : i64, scratch_operands = 0 : i64, tpu.core_type = #tpu.core_type<tc>} {
    %c0 = arith.constant 0 : index
    %c0_0 = arith.constant 0 : index
    %0 = vector.load %arg0[%c0, %c0_0] : memref<8x128xbf16, #tpu.memory_space<vmem>>, vector<8x128xbf16>
    %1 = arith.extf %0 : vector<8x128xbf16> to vector<8x128xf32>
    %c0_1 = arith.constant 0 : index
    %c0_2 = arith.constant 0 : index
    %2 = vector.load %arg1[%c0_1, %c0_2] : memref<8x128xf32, #tpu.memory_space<vmem>>, vector<8x128xf32>
    %cst = arith.constant 0.000000e+00 : f32
    %3 = vector.broadcast %cst : f32 to vector<8x128xf32>
    %4 = arith.subf %3, %1 : vector<8x128xf32>
    %5 = math.exp %4 : vector<8x128xf32>
    %cst_3 = arith.constant 1.000000e+00 : f32
    %6 = vector.broadcast %cst_3 : f32 to vector<8x128xf32>
    %7 = arith.addf %6, %5 : vector<8x128xf32>
    %cst_4 = arith.constant 1.000000e+00 : f32
    %8 = vector.broadcast %cst_4 : f32 to vector<8x128xf32>
    %9 = arith.divf %8, %7 : vector<8x128xf32>
    %cst_5 = arith.constant 1.000000e+00 : f32
    %10 = vector.broadcast %cst_5 : f32 to vector<8x128xf32>
    %11 = arith.subf %10, %9 : vector<8x128xf32>
    %cst_6 = arith.constant 5.000000e-02 : f32
    %12 = vector.broadcast %cst_6 : f32 to vector<8x128xf32>
    %13 = arith.addf %11, %12 : vector<8x128xf32>
    %cst_7 = arith.constant 1.000000e+00 : f32
    %14 = vector.broadcast %cst_7 : f32 to vector<8x128xf32>
    %15 = arith.minimumf %13, %14 : vector<8x128xf32>
    %cst_8 = arith.constant 5.000000e-01 : f32
    %16 = vector.broadcast %cst_8 : f32 to vector<8x128xf32>
    %17 = arith.cmpf ogt, %2, %16 : vector<8x128xf32>
    %18 = arith.select %17, %9, %15 : vector<8x128xi1>, vector<8x128xf32>
    %cst_9 = arith.constant 9.99999993E-9 : f32
    %19 = vector.broadcast %cst_9 : f32 to vector<8x128xf32>
    %20 = arith.maximumf %18, %19 : vector<8x128xf32>
    %21 = math.log %20 : vector<8x128xf32>
    %cst_10 = arith.constant 1.000000e+00 : f32
    %22 = vector.broadcast %cst_10 : f32 to vector<8x128xf32>
    %23 = arith.subf %22, %18 : vector<8x128xf32>
    %24 = arith.mulf %23, %23 : vector<8x128xf32>
    %25 = arith.mulf %24, %24 : vector<8x128xf32>
    %26 = arith.select %17, %23, %25 : vector<8x128xi1>, vector<8x128xf32>
    %27 = arith.mulf %21, %26 : vector<8x128xf32>
    %28 = vector.shape_cast %27 : vector<8x128xf32> to vector<1x8x128xf32>
    %cst_11 = arith.constant dense<0.000000e+00> : vector<1xf32>
    %29 = vector.multi_reduction <add>, %28, %cst_11 [1, 2] : vector<1x8x128xf32> to vector<1xf32>
    %30 = vector.shape_cast %29 : vector<1xf32> to vector<1x1x1xf32>
    %31 = vector.extract %30[0, 0, 0] : f32 from vector<1x1x1xf32>
    %cst_12 = arith.constant 0.000000e+00 : f32
    %32 = arith.subf %cst_12, %31 : f32
    %c0_13 = arith.constant 0 : index
    %c0_14 = arith.constant 0 : index
    %33 = memref.load %arg2[%c0_13, %c0_14] : memref<1x1xf32, #tpu.memory_space<smem>>
    memref.store %32, %arg2[%c0_13, %c0_14] : memref<1x1xf32, #tpu.memory_space<smem>>
    return
  }
}

</mosaic_0001>

<bundles_post_ra>
// kernel: tpu_custom_call.1
= control target key start
LH: loop header
LB: loop body
LE: loop exit
PB: predicated region body
PF: predicated region fallthrough
CT: control target
= control target key end

     0   :  { %7 = vsyncpa [#allocation3], 0  ;;  %s210_s0 = inlined_call_operand.hbm [shape: bf16[8,128], index: 0, kind: input, shape index: {}]   ;;  %s211_s1 = inlined_call_operand.hbm [shape: f32[8,128], index: 1, kind: input, shape index: {}]   ;;  %s212_s2 = inlined_call_operand.hbm [shape: f32[1,1], index: 2, kind: output, shape index: {}]  }
   0x1   :  { %8 = vsyncpa [#allocation6], 0 }
   0x2   :  { %9 = vsyncpa [#allocation4], 0  ;;  %s156_s9 = smov [#allocation2]   ;;  %s157_s11 = smov [#allocation5]  }
   0x3   :  { %s16_s10 = sshll.u32 %s156_s9, 4  ;;  %s26_s12 = sshll.u32 %s157_s11, 4  ;;  %s17_s10 = int_to_ptr.vmem [resolvable:$true] %s16_s10  ;;  %s27_s12 = int_to_ptr.vmem [resolvable:$true] %s26_s12 }
   0x4   :  { %s96_s15 = scalar_lea.hbm %s210_s0, 64 }
   0x5   :  { %p97_p0 = scmp.ne.s32.totalorder %s210_s0, %s96_s15  ;;  %p100_p1 = scmp.lt.u32.totalorder %s96_s15, %s210_s0 }
   0x7   :  { %p102_p2 = pnand %p100_p1, %p97_p0 }
   0x9   :  { %105 = shalt.err (!%p102_p2)
}
   0xa   :  { %s106_s20 = scalar_lea.vmem %s17_s10, 64  ;;  %p111_p4 = scmp.lt.s32.totalorder %s17_s10, %s17_s10 }
   0xb   :  { %p107_p3 = scmp.ne.s32.totalorder %s17_s10, %s106_s20  ;;  %p112_p5 = scmp.lt.s32.totalorder %s106_s20, %s106_s20 }
   0xd   :  { %p113_p6 = por %p112_p5, %p111_p4 }
   0xf   :  { %p114_p7 = pnand %p113_p6, %p107_p3 }
  0x11   :  { %117 = shalt.err (!%p114_p7)
}
  0x12   :  { %19 = dma.hbm_to_vmem [thread:$0]  %s210_s0, 64, %s17_s10, [#allocation3]  }
  0x13   :  { %s118_s25 = scalar_lea.hbm %s211_s1, 128 }
  0x14   :  { %p119_p8 = scmp.ne.s32.totalorder %s211_s1, %s118_s25  ;;  %p122_p9 = scmp.lt.u32.totalorder %s118_s25, %s211_s1 }
  0x16   :  { %p124_p10 = pnand %p122_p9, %p119_p8 }
  0x18   :  { %127 = shalt.err (!%p124_p10)
}
  0x19   :  { %s128_s30 = scalar_lea.vmem %s27_s12, 128  ;;  %p133_p12 = scmp.lt.s32.totalorder %s27_s12, %s27_s12 }
  0x1a   :  { %p129_p11 = scmp.ne.s32.totalorder %s27_s12, %s128_s30  ;;  %p134_p13 = scmp.lt.s32.totalorder %s128_s30, %s128_s30 }
  0x1c   :  { %p135_p0 = por %p134_p13, %p133_p12 }
  0x1e   :  { %p136_p1 = pnand %p135_p0, %p129_p11 }
  0x20   :  { %139 = shalt.err (!%p136_p1)
}
  0x21   :  { %29 = dma.hbm_to_vmem [thread:$0]  %s211_s1, 128, %s27_s12, [#allocation6]  }
  0x22   :  { %150 = dma.done.wait [#allocation3], 64  }
  0x23   :  { %151 = vsyncadd [#allocation3], 4294967232 }
  0x24   :  { %152 = dma.done.wait [#allocation6], 128  }
  0x25   :  { %153 = vsyncadd [#allocation6], 4294967168  ;;  %v36_v0 = vld [vmem:[#allocation2] sm:$0xf]  ;;  %v38_v7 = vld [vmem:[#allocation5] sm:$0xff]  ;;  %s140_s7 = scalar_lea.hbm %s212_s2, 16 }
  0x26   :  { %v37_v1 = vunpack.c.l.bf16 %v36_v0  ;;  %vm48_vm0 = vcmp.gt.f32.partialorder %v38_v7, 0.5  ;;  %p141_p2 = scmp.ne.s32.totalorder %s212_s2, %s140_s7  ;;  %p144_p3 = scmp.lt.u32.totalorder %s140_s7, %s212_s2 }
  0x28   :  { %v39_v2 = vsub.f32 0.0, %v37_v1  ;;  %p146_p4 = pnand %p144_p3, %p141_p2 }
  0x2a   :  { %v40_v3 = vmul.f32 1.442695, %v39_v2 }
  0x2c   :  { %90 = vpow2.f32 %v40_v3 }
  0x36   :  { %v91_v4 = vpop.eup %90 }
  0x37   :  { %v42_v5 = vadd.f32 1.0, %v91_v4 }
  0x39   :  { %92 = vrcp.f32 %v42_v5 }
  0x43   :  { %v93_v6 = vpop.eup %92 }
  0x44   :  { %v45_v8 = vsub.f32 1.0, %v93_v6 }
  0x46   :  { %v46_v9 = vadd.f32 0.05, %v45_v8 }
  0x48   :  { %v47_v10 = vmin.f32 %v46_v9, 1.0 }
  0x4a   :  { %v49_v11 = vsel %vm48_vm0, %v93_v6, %v47_v10 }
  0x4b   :  { %v50_v12 = vmax.f32 %v49_v11, 1e-08  ;;  %v53_v13 = vsub.f32 1.0, %v49_v11 }
  0x4d   :  { %94 = vlog2.f32 %v50_v12  ;;  %v54_v14 = vmul.f32 %v53_v13, %v53_v13 }
  0x4f   :  { %v55_v15 = vmul.f32 %v54_v14, %v54_v14 }
  0x51   :  { %v56_v17 = vsel %vm48_vm0, %v53_v13, %v55_v15 }
  0x57   :  { %v95_v16 = vpop.eup %94 }
  0x58   :  { %v52_v18 = vmul.f32 0.6931472, %v95_v16 }
  0x5a   :  { %v57_v19 = vmul.f32 %v56_v17, %v52_v18 }
  0x5c   :  { %58 = vadd.xlane.f32.xlu0 %v57_v19 }
  0xe9   :  { %v59_v20 = vpop.xlane.xlu0 %58 }
  0xea   :  { %v60_v21 = vrot.slane %v59_v20, 4 }
  0xec   :  { %v61_v22 = vadd.f32 %v60_v21, %v59_v20 }
  0xee   :  { %v62_v23 = vrot.slane %v61_v22, 2 }
  0xf0   :  { %v63_v24 = vadd.f32 %v62_v23, %v61_v22 }
  0xf2   :  { %v64_v25 = vrot.slane %v63_v24, 1 }
  0xf4   :  { %v65_v26 = vadd.f32 %v64_v25, %v63_v24 }
  0xf6   :  { %85 = vpush %v65_v26 }
 0x127   :  { %s86_s1 = spop %85 }
 0x128   :  { %s67_s4 = ssub.f32 0.0, %s86_s1 }
 0x12a   :  { %69 = sst [smem:[#allocation7]] %s67_s4 }
 0x12b   :  { %149 = shalt.err (!%p146_p4)
}
 0x12c   :  { %s158_s12 = smov [#allocation7]  }
 0x12d   :  { %77 = dma.smem_to_hbm %s158_s12, 16, %s212_s2, [#allocation4]  }
 0x12e   :  { %154 = dma.done.wait [#allocation4], 16  }
 0x12f   :  { %155 = vsyncadd [#allocation4], 4294967280 }
 0x130   :  { %81 = sfence }
 0x131   :  { %82 = vsyncpa [#allocation3], 1 }
 0x132   :  { %83 = vsyncpa [#allocation6], 1 }
 0x133   :  { %84 = vsyncpa [#allocation4], 1 }

</bundles_post_ra>
